<compile_context>
chip_gen: v6e
topology: v6e:2x2x1
jax: 0.10.0
libtpu: 0.0.40
codegen_flags: <defaults>
</compile_context>

<pallas_src>
import functools

import jax
import jax.numpy as jnp
from jax import lax
from jax.experimental import pallas as pl
from jax.experimental.pallas import tpu as pltpu

EPS = 1e-5
NEG_SLOPE = 0.2
LANE = 128


def _round_up(x, m):
    return ((x + m - 1) // m) * m


# ---------------------------------------------------------------------------
# Kernel 1: tiled (im2col patches) @ weight on the MXU + bias, plus per-tile
# partial BatchNorm statistics (sum, sum-of-squares) per output channel.
# ---------------------------------------------------------------------------
def _matmul_stats_kernel(p_ref, w_ref, b_ref, y_ref, stats_ref, *, tm, m_valid):
    # bf16 operands, f32 accumulation on the MXU.
    y = jnp.dot(p_ref[...], w_ref[...], preferred_element_type=jnp.float32)
    y = y + b_ref[...]                                    # [tm, Cp] + [1, Cp]
    y_ref[...] = y

    # Partial BN stats for this tile; mask out zero-padded rows so the global
    # mean/var over (N, H, W) are exact.
    row0 = pl.program_id(0) * tm
    rows = row0 + lax.broadcasted_iota(jnp.int32, y.shape, 0)
    yv = jnp.where(rows < m_valid, y, 0.0)
    s = jnp.sum(yv, axis=0, keepdims=True)                # [1, Cp]
    ss = jnp.sum(yv * y, axis=0, keepdims=True)           # masked y^2
    stats_ref[...] = jnp.concatenate([s, ss], axis=0)[None]   # [1, 2, Cp]


# ---------------------------------------------------------------------------
# Kernel 2: apply BatchNorm (precomputed per-channel scale/shift) + LeakyReLU.
# Pure mem-bound pass; lane-dense (Cp = multiple of 128) unmasked stores.
# ---------------------------------------------------------------------------
def _bn_act_kernel(y_ref, scale_ref, shift_ref, o_ref):
    z = y_ref[...] * scale_ref[...] + shift_ref[...]
    o_ref[...] = jnp.where(z > 0, z, NEG_SLOPE * z).astype(o_ref.dtype)


def _im2col_nhwc(x_nhwc, kh, kw, stride, pad):
    N, H, W, Cin = x_nhwc.shape
    xp = jnp.pad(x_nhwc, ((0, 0), (pad, pad), (pad, pad), (0, 0)))
    OH = (H + 2 * pad - kh) // stride + 1
    OW = (W + 2 * pad - kw) // stride + 1
    cols = []
    for i in range(kh):
        for j in range(kw):
            cols.append(xp[:, i:i + stride * OH:stride, j:j + stride * OW:stride, :])
    # K-axis ordering: (kh, kw, cin)
    patches = jnp.stack(cols, axis=3)                     # [N, OH, OW, kh*kw, Cin]
    patches = patches.reshape(N * OH * OW, kh * kw * Cin)
    return patches, OH, OW


def conv_block_forward(x_nchw, weight, bias, gamma, beta,
                       kernel=5, padding=1, stride=1, tm=256):
    """x_nchw: [N, Cin, H, W]; weight: [Cout, Cin, kh, kw] (PyTorch layouts)."""
    N, Cin, H, W = x_nchw.shape
    Cout, _, kh, kw = weight.shape

    # PyTorch-facing I/O stays NCHW; internal compute is a lane-dense [M, Cp]
    # slab (M = N*OH*OW).
    x_nhwc = jnp.transpose(x_nchw, (0, 2, 3, 1))
    # NOTE: im2col materializes kh*kw x the input bytes in HBM.  For large
    # problems this should move into the kernel (manual DMA of shifted NHWC
    # slices as a reduction grid axis); kept as XLA glue at these shapes, with
    # bf16 patches to halve the dominant HBM traffic.
    patches, OH, OW = _im2col_nhwc(x_nhwc, kh, kw, stride, padding)   # [M, K]
    M, K = patches.shape

    K_pad = _round_up(K, LANE)
    C_pad = _round_up(Cout, LANE)
    M_pad = _round_up(M, tm)
    n_tiles = M_pad // tm

    # Zero-pad to lane-dense tiles; bf16 operands for the MXU (f32 accumulate).
    patches_p = jnp.pad(patches, ((0, M_pad - M), (0, K_pad - K))).astype(jnp.bfloat16)
    w_mat = jnp.transpose(weight, (2, 3, 1, 0)).reshape(K, Cout)      # (kh,kw,cin) x Cout
    w_p = jnp.pad(w_mat, ((0, K_pad - K), (0, C_pad - Cout))).astype(jnp.bfloat16)
    b_row = jnp.pad(bias.reshape(1, Cout),
                    ((0, 0), (0, C_pad - Cout))).astype(jnp.float32)
    g_row = jnp.pad(gamma, (0, C_pad - Cout)).astype(jnp.float32)
    beta_row = jnp.pad(beta, (0, C_pad - Cout)).astype(jnp.float32)

    kern = functools.partial(_matmul_stats_kernel, tm=tm, m_valid=M)
    y_flat, stats = pl.pallas_call(
        kern,
        out_shape=(jax.ShapeDtypeStruct((M_pad, C_pad), jnp.float32),
                   jax.ShapeDtypeStruct((n_tiles, 2, C_pad), jnp.float32)),
        grid=(n_tiles,),
        in_specs=[
            pl.BlockSpec((tm, K_pad), lambda i: (i, 0)),
            pl.BlockSpec((K_pad, C_pad), lambda i: (0, 0)),
            pl.BlockSpec((1, C_pad), lambda i: (0, 0)),
        ],
        out_specs=(
            pl.BlockSpec((tm, C_pad), lambda i: (i, 0)),
            pl.BlockSpec((1, 2, C_pad), lambda i: (i, 0, 0)),
        ),
        compiler_params=pltpu.CompilerParams(
            dimension_semantics=("parallel",),
            vmem_limit_bytes=32 * 1024 * 1024),
        cost_estimate=pl.CostEstimate(
            flops=2 * M_pad * K_pad * C_pad,
            transcendentals=0,
            bytes_accessed=(M_pad * K_pad * 2 + K_pad * C_pad * 2
                            + M_pad * C_pad * 4 + n_tiles * 2 * C_pad * 4)),
    )(patches_p, w_p, b_row)

    # Finalize BN statistics (tiny [Cp] work -> plain XLA).  f32 accumulation
    # keeps the E[x^2]-E[x]^2 cancellation benign at these magnitudes.
    inv_m = jnp.float32(1.0 / M)
    sums = jnp.sum(stats[:, 0, :], axis=0)
    sumsq = jnp.sum(stats[:, 1, :], axis=0)
    mean = sums * inv_m
    var = jnp.maximum(sumsq * inv_m - mean * mean, 0.0)
    scale_vec = g_row * lax.rsqrt(var + EPS)
    shift_vec = beta_row - mean * scale_vec
    scale = scale_vec.reshape(1, C_pad)
    shift = shift_vec.reshape(1, C_pad)

    out_flat = pl.pallas_call(
        _bn_act_kernel,
        out_shape=jax.ShapeDtypeStruct((M_pad, C_pad), jnp.float32),
        grid=(n_tiles,),
        in_specs=[
            pl.BlockSpec((tm, C_pad), lambda i: (i, 0)),
            pl.BlockSpec((1, C_pad), lambda i: (0, 0)),
            pl.BlockSpec((1, C_pad), lambda i: (0, 0)),
        ],
        out_specs=pl.BlockSpec((tm, C_pad), lambda i: (i, 0)),
        compiler_params=pltpu.CompilerParams(
            dimension_semantics=("parallel",),
            vmem_limit_bytes=32 * 1024 * 1024),
        cost_estimate=pl.CostEstimate(
            flops=3 * M_pad * C_pad,
            transcendentals=0,
            bytes_accessed=2 * M_pad * C_pad * 4 + 2 * C_pad * 4),
    )(y_flat, scale, shift)

    out_nhwc = out_flat[:M, :Cout].reshape(N, OH, OW, Cout)
    return jnp.transpose(out_nhwc, (0, 3, 1, 2))          # back to NCHW


def _reference(x_nchw, weight, bias, gamma, beta, kernel=5, padding=1, stride=1):
    y = lax.conv_general_dilated(
        x_nchw, weight, window_strides=(stride, stride),
        padding=[(padding, padding), (padding, padding)],
        dimension_numbers=("NCHW", "OIHW", "NCHW"))
    y = y + bias.reshape(1, -1, 1, 1)
    mean = jnp.mean(y, axis=(0, 2, 3), keepdims=True)
    var = jnp.mean((y - mean) ** 2, axis=(0, 2, 3), keepdims=True)
    yn = (y - mean) * lax.rsqrt(var + EPS)
    yn = yn * gamma.reshape(1, -1, 1, 1) + beta.reshape(1, -1, 1, 1)
    return jnp.where(yn > 0, yn, NEG_SLOPE * yn)


if __name__ == "__main__":
    # Small shapes consistent with the module: N=2, Cin=4, H=W=16, Cout=8,
    # kernel=5, padding=1, stride=1  ->  output [2, 8, 14, 14].
    key = jax.random.PRNGKey(0)
    k_x, k_w, k_b = jax.random.split(key, 3)

    N, Cin, H, W = 2, 4, 16, 16
    Cout, kh, kw = 8, 5, 5

    x = jax.random.normal(k_x, (N, Cin, H, W), dtype=jnp.float32)

    # Deterministic PyTorch-style init: U(-1/sqrt(fan_in), 1/sqrt(fan_in)).
    fan_in = Cin * kh * kw
    bound = 1.0 / (fan_in ** 0.5)
    weight = jax.random.uniform(k_w, (Cout, Cin, kh, kw), jnp.float32,
                                minval=-bound, maxval=bound)
    bias = jax.random.uniform(k_b, (Cout,), jnp.float32,
                              minval=-bound, maxval=bound)
    gamma = jnp.ones((Cout,), jnp.float32)   # BatchNorm2d affine init
    beta = jnp.zeros((Cout,), jnp.float32)

    out = conv_block_forward(x, weight, bias, gamma, beta,
                             kernel=5, padding=1, stride=1, tm=256)
    out = jax.block_until_ready(out)

    ref = _reference(x, weight, bias, gamma, beta)
    assert out.shape == (N, Cout, 14, 14), out.shape
    # Tolerance deliberately relaxed vs the all-f32 reference because the MXU
    # matmul uses bf16 operands (f32 accumulation); observed error is a few e-3.
    assert jnp.allclose(out, ref, atol=2e-2, rtol=2e-2), \
        float(jnp.max(jnp.abs(out - ref)))

    print("KERNEL_OK")
</pallas_src>

<mosaic_0001>
module attributes {stable_mosaic.version = 11 : i64} {
  func.func @_matmul_stats_kernel(%arg0: i32, %arg1: memref<256x128xbf16, #tpu.memory_space<vmem>>, %arg2: memref<128x128xbf16, #tpu.memory_space<vmem>>, %arg3: memref<1x128xf32, #tpu.memory_space<vmem>>, %arg4: memref<256x128xf32, #tpu.memory_space<vmem>>, %arg5: memref<1x2x128xf32, #tpu.memory_space<vmem>>) attributes {dimension_semantics = [#tpu.dimension_semantics<parallel>], iteration_bounds = array<i64: 2>, scalar_prefetch = 0 : i64, scratch_operands = 0 : i64, tpu.core_type = #tpu.core_type<tc>, window_params = [{transform_indices = @transform_0, window_bounds = array<i64: 256, 128>}, {pipeline_mode = #tpu.pipeline_mode<synchronous>, transform_indices = @transform_1, window_bounds = array<i64: 128, 128>}, {pipeline_mode = #tpu.pipeline_mode<synchronous>, transform_indices = @transform_2, window_bounds = array<i64: 1, 128>}, {transform_indices = @transform_3, window_bounds = array<i64: 256, 128>}, {transform_indices = @transform_4, window_bounds = array<i64: 1, 2, 128>}]} {
    %c0 = arith.constant 0 : index
    %c0_0 = arith.constant 0 : index
    %0 = vector.load %arg1[%c0, %c0_0] : memref<256x128xbf16, #tpu.memory_space<vmem>>, vector<256x128xbf16>
    %c0_1 = arith.constant 0 : index
    %c0_2 = arith.constant 0 : index
    %1 = vector.load %arg2[%c0_1, %c0_2] : memref<128x128xbf16, #tpu.memory_space<vmem>>, vector<128x128xbf16>
    %cst = arith.constant dense<0.000000e+00> : vector<256x128xf32>
    %2 = tpu.matmul %0, %1, %cst {dimension_numbers = #tpu.dot_dimension_numbers<[1], [0], [0], [1], [0, 0, 1, 1], [], []>} : vector<256x128xbf16>, vector<128x128xbf16>, vector<256x128xf32> -> vector<256x128xf32>
    %c0_3 = arith.constant 0 : index
    %c0_4 = arith.constant 0 : index
    %3 = vector.load %arg3[%c0_3, %c0_4] : memref<1x128xf32, #tpu.memory_space<vmem>>, vector<1x128xf32>
    %4 = vector.broadcast %3 : vector<1x128xf32> to vector<256x128xf32>
    %5 = arith.addf %2, %4 : vector<256x128xf32>
    %c0_5 = arith.constant 0 : index
    %c0_6 = arith.constant 0 : index
    %6 = vector.load %arg4[%c0_5, %c0_6] : memref<256x128xf32, #tpu.memory_space<vmem>>, vector<256x128xf32>
    tpu.vector_store %arg4[%c0_5, %c0_6], %5 {strides = array<i32>} : memref<256x128xf32, #tpu.memory_space<vmem>>, vector<256x128xf32>,
    %c256_i32 = arith.constant 256 : i32
    %7 = arith.muli %arg0, %c256_i32 : i32
    %8 = tpu.iota {dimensions = array<i32: 0>} : vector<256x128xi32>
    %9 = vector.broadcast %7 : i32 to vector<256x128xi32>
    %10 = arith.addi %9, %8 : vector<256x128xi32>
    %c392_i32 = arith.constant 392 : i32
    %11 = vector.broadcast %c392_i32 : i32 to vector<256x128xi32>
    %12 = arith.cmpi slt, %10, %11 : vector<256x128xi32>
    %cst_7 = arith.constant 0.000000e+00 : f32
    %13 = vector.broadcast %cst_7 : f32 to vector<256x128xf32>
    %14 = arith.select %12, %5, %13 : vector<256x128xi1>, vector<256x128xf32>
    %cst_8 = arith.constant dense<0.000000e+00> : vector<128xf32>
    %15 = vector.multi_reduction <add>, %14, %cst_8 [0] : vector<256x128xf32> to vector<128xf32>
    %16 = vector.shape_cast %15 : vector<128xf32> to vector<1x128xf32>
    %17 = arith.mulf %14, %5 : vector<256x128xf32>
    %cst_9 = arith.constant dense<0.000000e+00> : vector<128xf32>
    %18 = vector.multi_reduction <add>, %17, %cst_9 [0] : vector<256x128xf32> to vector<128xf32>
    %19 = vector.shape_cast %18 : vector<128xf32> to vector<1x128xf32>
    %20 = tpu.concatenate %16, %19 in 0 : vector<1x128xf32>, vector<1x128xf32> -> vector<2x128xf32>
    %21 = vector.shape_cast %20 : vector<2x128xf32> to vector<1x2x128xf32>
    %c0_10 = arith.constant 0 : index
    %c0_11 = arith.constant 0 : index
    %c0_12 = arith.constant 0 : index
    %22 = vector.load %arg5[%c0_10, %c0_11, %c0_12] : memref<1x2x128xf32, #tpu.memory_space<vmem>>, vector<1x2x128xf32>
    tpu.vector_store %arg5[%c0_10, %c0_11, %c0_12], %21 {strides = array<i32>} : memref<1x2x128xf32, #tpu.memory_space<vmem>>, vector<1x2x128xf32>,
    return
  }
  func.func @transform_0(%arg0: i32) -> (i32, i32) {
    %c0_i32 = arith.constant 0 : i32
    %c0_i32_0 = arith.constant 0 : i32
    return %arg0, %c0_i32 : i32, i32
  }
  func.func @transform_1(%arg0: i32) -> (i32, i32) {
    %c0_i32 = arith.constant 0 : i32
    %c0_i32_0 = arith.constant 0 : i32
    %c0_i32_1 = arith.constant 0 : i32
    return %c0_i32, %c0_i32_0 : i32, i32
  }
  func.func @transform_2(%arg0: i32) -> (i32, i32) {
    %c0_i32 = arith.constant 0 : i32
    %c0_i32_0 = arith.constant 0 : i32
    %c0_i32_1 = arith.constant 0 : i32
    return %c0_i32, %c0_i32_0 : i32, i32
  }
  func.func @transform_3(%arg0: i32) -> (i32, i32) {
    %c0_i32 = arith.constant 0 : i32
    %c0_i32_0 = arith.constant 0 : i32
    return %arg0, %c0_i32 : i32, i32
  }
  func.func @transform_4(%arg0: i32) -> (i32, i32, i32) {
    %c0_i32 = arith.constant 0 : i32
    %c0_i32_0 = arith.constant 0 : i32
    %c0_i32_1 = arith.constant 0 : i32
    return %arg0, %c0_i32, %c0_i32_0 : i32, i32, i32
  }
}

</mosaic_0001>

<bundles_post_ra>
// kernel: tpu_custom_call.1
= control target key start
LH: loop header
LB: loop body
LE: loop exit
PB: predicated region body
PF: predicated region fallthrough
CT: control target
= control target key end

     0   :  { %10 = vsyncpa [#allocation3], 0  ;;  %s1960_s0 = inlined_call_operand.hbm [shape: bf16[512,128], index: 0, kind: input, shape index: {}]   ;;  %s1961_s1 = inlined_call_operand.hbm [shape: bf16[128,128], index: 1, kind: input, shape index: {}]   ;;  %s1962_s2 = inlined_call_operand.vmem [shape: f32[1,128], index: 2, kind: input, shape index: {}]   ;;  %s1963_s3 = inlined_call_operand.hbm [shape: f32[512,128], index: 3, kind: output, shape index: {0}]   ;;  %s1964_s4 = inlined_call_operand.hbm [shape: f32[2,2,128], index: 4, kind: output, shape index: {1}]  }
   0x1   :  { %12 = vsyncpa [#allocation3 + $0x1], 0 }
   0x2   :  { %13 = vsyncpa [#allocation6], 0 }
   0x3   :  { %14 = vsyncpa [#allocation4], 0 }
   0x4   :  { %16 = vsyncpa [#allocation4 + $0x1], 0 }
   0x5   :  { %17 = vsyncpa [#allocation9], 0 }
   0x6   :  { %19 = vsyncpa [#allocation9 + $0x1], 0  ;;  %s1436_s15 = smov 0   ;;  %s1438_s16 = smov 0  }
   0x7   :  { %s1440_s17 = smov 0   ;;  %s1442_s18 = smov 0  }
   0x8 LB: > { %s1457_s19 = sadd.s32 4294967295, %s1401_s18   ;;  %s1024_s20 = sadd.s32 4294967294, %s1401_s18   ;;  %s1401_s18 = sphi %s1442_s18, %s1986_s18   ;;  %s1397_s17 = sphi %s1440_s17, %s1985_s17   ;;  %s1393_s16 = sphi %s1438_s16, %s1984_s16   ;;  %s1389_s15 = sphi %s1436_s15, %s1983_s15  }
   0x9   : > { %p45_p0 = scmp.ne.s32.totalorder %s1393_s16, %s1389_s15  ;;  %p1965_p1 = scmp.eq.s32.totalorder %s1457_s19, 0 }
   0xa   : > { %p117_p3 = scmp.eq.s32.totalorder %s1024_s20, 1  ;;  %p1025_p5 = scmp.ge.s32.totalorder %s1401_s18, 1 }
   0xb   : > { %p1466_p4 = por %p1965_p1, %p45_p0  ;;  %p150_p7 = scmp.lt.s32.totalorder %s1401_s18, 3 }
   0xc   : > { %p1471_p6 = por %p117_p3, %p45_p0  ;;  %s1403_s24 = smov [#allocation5]  }
   0xd   : > { %s1969_s21 = scalar_select %p1466_p4, 1, 0 }
   0xe   : > { %s1970_s22 = scalar_select %p1471_p6, 1, 0 }
   0xf   : > { %p1476_p8 = pnand %p1025_p5, %p150_p7  ;;  %s162_s25 = sshll.u32 %s1403_s24, 4  ;;  %s163_s25 = int_to_ptr.vmem [resolvable:$true] %s162_s25 }
  0x10   : > { %s1490_s27 = sadd.s32 1, %s1401_s18   ;;  %s32_s28 = sadd.s32 1, %s1397_s17 }
  0x11   : > { %s1971_s23 = scalar_select %p1476_p8, 1, 0 }
  0x12   : > { %p1169_p9 = pneg %p1476_p8  ;;  %s29_s29 = ssub.s32 %s1401_s18, %s1490_s27 }
  0x13   : > { %s1260_s30 = scalar_lea.vmem %s163_s25, 1024  ;;  %p1268_p5 = scmp.lt.s32.totalorder %s163_s25, %s163_s25 }
  0x14   : > { %p1485_p11 = pnand %p1169_p9, %p1965_p1  ;;  %p1261_p13 = scmp.ne.s32.totalorder %s163_s25, %s1260_s30 }
  0x15   : > { %p1269_p7 = scmp.lt.s32.totalorder %s1260_s30, %s1260_s30 }
  0x16   : > { %p1251_p12 = pneg %p1485_p11 }
  0x17   : > { %p1270_p10 = por %p1269_p7, %p1268_p5 }
  0x18   : > { %p1263_p0 = pnand %p1261_p13, %p1251_p12 }
  0x1a   : > { %p1264_p3 = pneg %p1263_p0 }
  0x1c   : > { %p1271_p2 = pnand %p1270_p10, %p1264_p3 }
  0x1e   : > { %1274 = shalt.err (!%p1271_p2)
}
  0x1f   : > { %s1404_s5 = smov 64   ;;  %s1405_s6 = smov 4  }
  0x20   : > { %1172 = dma.hbm_to_vmem [thread:$0]  (!%p1485_p11), %s1961_s1, 1024, %s163_s25, [#allocation6], %s1404_s5, %s1404_s5, %s1405_s6  }
  0x21   : > { %p30_p2 = scmp.eq.s32.totalorder %s29_s29, 0  ;;  %p39_p9 = scmp.ne.s32.totalorder %s1397_s17, %s1393_s16 }
  0x22   : > { %p40_p10 = scmp.eq.s32.totalorder %s1401_s18, 0  ;;  %p1185_p12 = scmp.lt.s32.totalorder %s1401_s18, 2 }
  0x23   : > { %s1510_s9 = scalar_select %p30_p2, %s1397_s17, %s32_s28  }
  0x24   : > { %p41_p13 = por %p40_p10, %p39_p9  ;;  %p1973_p0 = scmp.eq.s32.totalorder %s1457_s19, 1 }
  0x25   : > { %s179_s11 = sand.u32 1, %s1397_s17   ;;  %s1069_s12 = sshll.u32 %s1401_s18, 11 }
  0x26   : > { %p1514_p3 = por %p1973_p0, %p39_p9  ;;  %s1028_s13 = sshll.u32 %s179_s11, 7 }
  0x27   : > { %s1523_s24 = scalar_lea.hbm %s1960_s0, %s1069_s12  ;;  %s183_s25 = scalar_lea.vmem [#allocation2], %s1028_s13 }
  0x28   : > { %s1974_s10 = scalar_select %p1514_p3, 1, 0 }
  0x29   : > { %s190_s26 = sshll.u32 %s183_s25, 4  ;;  %p1525_p11 = pnand %p1185_p12, %p41_p13  ;;  %s1529_s26 = int_to_ptr.vmem [resolvable:$true] %s190_s26 }
  0x2a   : > { %s1531_s29 = scalar_lea.sflag [#allocation3], %s179_s11  ;;  %s1275_s30 = scalar_lea.hbm %s1523_s24, 2048 }
  0x2b   : > { %p1276_p5 = scmp.ne.s32.totalorder %s1523_s24, %s1275_s30  ;;  %p1277_p7 = pneg %p1525_p11 }
  0x2c   : > { %s1280_s12 = scalar_lea.hbm %s1960_s0, 4096  ;;  %p1281_p10 = scmp.lt.s32.totalorder %s1523_s24, %s1960_s0 }
  0x2d   : > { %p1278_p2 = pnand %p1277_p7, %p1276_p5  ;;  %p1282_p12 = scmp.lt.s32.totalorder %s1280_s12, %s1275_s30 }
  0x2f   : > { %p1279_p9 = pneg %p1278_p2  ;;  %p1283_p13 = por %p1282_p12, %p1281_p10 }
  0x31   : > { %p1284_p0 = pnand %p1283_p13, %p1279_p9 }
  0x33   : > { %1287 = shalt.err (!%p1284_p0)
}
  0x34   : > { %s1288_s11 = scalar_lea.vmem %s1529_s26, 2048  ;;  %s1406_s20 = smov [#allocation2]  }
  0x35   : > { %p1289_p1 = scmp.ne.s32.totalorder %s1529_s26, %s1288_s11  ;;  %s1293_s25 = sshll.u32 %s1406_s20, 4  ;;  %s1294_s25 = int_to_ptr.vmem [resolvable:$false] %s1293_s25 }
  0x36   : > { %s1295_s7 = scalar_lea.vmem %s1294_s25, 4096  ;;  %p1296_p2 = scmp.lt.s32.totalorder %s1529_s26, %s1294_s25 }
  0x37   : > { %p1291_p6 = pnand %p1289_p1, %p1277_p7  ;;  %p1297_p3 = scmp.lt.s32.totalorder %s1295_s7, %s1288_s11 }
  0x39   : > { %p1292_p5 = pneg %p1291_p6  ;;  %p1298_p4 = por %p1297_p3, %p1296_p2 }
  0x3b   : > { %p1299_p8 = pnand %p1298_p4, %p1292_p5 }
  0x3d   : > { %1302 = shalt.err (!%p1299_p8)
}
  0x3e   : > { %1176 = dma.hbm_to_vmem [thread:$0]  (!%p1525_p11), %s1523_s24, 2048, %s1529_s26, %s1531_s29, %s1404_s5, %s1404_s5, %s1405_s6  }
  0x3f   : > { %p1976_p1 = scmp.ne.s32.totalorder %s1971_s23, 0 }
  0x40   : > { %s1558_s30 = sand.u32 (!%p1976_p1), 1, %s1393_s16   ;;  %p1977_p4 = scmp.ne.s32.totalorder (!%p1976_p1), %s1969_s21, 0 }
  0x41   : > { %202 = sbr.rel (%p1976_p1) target bundleno = 410 (0x19a), region = 32  ;;  %s1032_s8 = sshll.u32 (!%p1976_p1), %s1558_s30, 7 }
  0x42   : > { %s205_s12 = scalar_lea.sflag (!%p1976_p1), [#allocation3], %s1558_s30  ;;  %s1562_s13 = scalar_lea.vmem (!%p1976_p1), [#allocation2], %s1032_s8 }
  0x46   : > { %1372 = dma.done.wait (%p1977_p4), %s205_s12, 2048  }
  0x47   : > { %1374 = vsyncadd (%p1977_p4), %s205_s12, 4294965248  ;;  %p1978_p6 = scmp.eq.s32.totalorder %s1457_s19, 0 }
  0x49   : > { %1376 = dma.done.wait (%p1978_p6), [#allocation6], 1024   ;;  %p1979_p8 = pmov %p1978_p6 }
  0x4a   : > { %v1225_v0 = vld [vmem:[#allocation5 + $0x38] sm:$0xff]   ;;  %v1226_v1 = vld [vmem:[#allocation5 + $0x30] sm:$0xff]   ;;  %v1227_v2 = vld [vmem:[#allocation5 + $0x28] sm:$0xff]   ;;  %v638_v24 = vlaneseq  ;;  %s1061_s21 = sshll.u32 %s1457_s19, 8  ;;  %s1034_s23 = sshll.u32 %s1558_s30, 8 }
  0x4b   : > { %1378 = vsyncadd (%p1979_p8), [#allocation6], 4294966272  ;;  %1095 = vmatprep.subr.bf16.mxu0 %v1225_v0  ;;  %1143 = vmatprep.subr.bf16.mxu1 %v1225_v0  ;;  %v1228_v3 = vld [vmem:[#allocation5 + $0x20] sm:$0xff]   ;;  %v1229_v5 = vld [vmem:[#allocation5 + $0x18] sm:$0xff]   ;;  %v1598_v28 = vstv %s1061_s21  ;;  %s1618_s24 = scalar_lea.vmem [#allocation7], %s1034_s23  ;;  %s1070_s26 = sshll.u32 %s1457_s19, 12 }
  0x4c   : > { %1096 = vmatpush3.bf16.msra.mxu0 %v1225_v0  ;;  %1151 = vmatpush3.bf16.msra.mxu1 %v1225_v0  ;;  %v1233_v4 = vld [vmem:[%s1562_s13] sm:$0xff]   ;;  %v1230_v6 = vld [vmem:[#allocation5 + $0x10] sm:$0xff]   ;;  %v1231_v8 = vld [vmem:[#allocation5 + $0x8] sm:$0xff]   ;;  %v1588_v25 = vshrl.u32 %v638_v24, 7  ;;  %s896_s28 = sshll.u32 %s1618_s24, 4  ;;  %s1807_s11 = scalar_lea.hbm %s1963_s3, %s1070_s26  ;;  %s1809_s28 = int_to_ptr.vmem [resolvable:$true] %s896_s28 }
  0x4d   : > { %1097 = vmatprep.subr.bf16.mxu0 %v1226_v1  ;;  %1144 = vmatprep.subr.bf16.mxu1 %v1226_v1  ;;  %v1241_v7 = vld [vmem:[%s1562_s13 + $0x40] sm:$0xff]   ;;  %v1234_v10 = vld [vmem:[%s1562_s13 + $0x8] sm:$0xff]   ;;  %v1235_v12 = vld [vmem:[%s1562_s13 + $0x10] sm:$0xff]   ;;  %s878_s20 = scalar_lea.sflag [#allocation4], %s1558_s30  ;;  %s1303_s25 = scalar_lea.vmem %s1809_s28, 4096 }
  0x4e   : > { %1111 = vmatprep.mubr.bf16.mxu0 %v1233_v4  ;;  %1127 = vmatprep.mubr.bf16.mxu1 %v1241_v7  ;;  %v1232_v9 = vld [vmem:[#allocation5] sm:$0xff]   ;;  %v1242_v11 = vld [vmem:[%s1562_s13 + $0x48] sm:$0xff]   ;;  %v1243_v13 = vld [vmem:[%s1562_s13 + $0x50] sm:$0xff]   ;;  %v641_v26 = vadd.s32 16, %v1588_v25  ;;  %v642_v29 = vadd.s32 24, %v1588_v25  ;;  %v640_v30 = vadd.s32 8, %v1588_v25  ;;  %v672_v32 = vadd.s32 %v1598_v28, %v1588_v25  ;;  %p1304_p3 = scmp.ne.s32.totalorder %s1809_s28, %s1303_s25 }
  0x4f   : > { %v1236_v14 = vld [vmem:[%s1562_s13 + $0x18] sm:$0xff]   ;;  %v1237_v16 = vld [vmem:[%s1562_s13 + $0x20] sm:$0xff]   ;;  %v1238_v18 = vld [vmem:[%s1562_s13 + $0x28] sm:$0xff]   ;;  %v645_v31 = vadd.s32 48, %v1588_v25  ;;  %v643_v33 = vadd.s32 32, %v1588_v25  ;;  %v646_v35 = vadd.s32 56, %v1588_v25 }
  0x50   : > { %1098 = vmatpush3.bf16.msra.mxu0 %v1226_v1  ;;  %1152 = vmatpush3.bf16.msra.mxu1 %v1226_v1  ;;  %v1244_v15 = vld [vmem:[%s1562_s13 + $0x58] sm:$0xff]   ;;  %v1245_v17 = vld [vmem:[%s1562_s13 + $0x60] sm:$0xff]   ;;  %v1246_v19 = vld [vmem:[%s1562_s13 + $0x68] sm:$0xff]   ;;  %v644_v36 = vadd.s32 40, %v1588_v25  ;;  %v674_v40 = vadd.s32 %v1598_v28, %v641_v26  ;;  %v675_v42 = vadd.s32 %v1598_v28, %v642_v29  ;;  %v673_v43 = vadd.s32 %v1598_v28, %v640_v30  ;;  %p1980_p11 = scmp.ne.s32.totalorder %s1974_s10, 0  ;;  %s1407_s7 = smov [#allocation7]  }
  0x51   : > { %1099 = vmatprep.subr.bf16.mxu0 %v1227_v2  ;;  %1145 = vmatprep.subr.bf16.mxu1 %v1227_v2  ;;  %v1239_v20 = vld [vmem:[%s1562_s13 + $0x30] sm:$0xff]   ;;  %v1240_v22 = vld [vmem:[%s1562_s13 + $0x38] sm:$0xff]   ;;  %v1596_v27 = vld [vmem:[%s1962_s2] ss:$0 sm:$0xff]  ;;  %v1616_v44 = vadd.s32 %v1598_v28, %v645_v31  ;;  %vm704_vm0 = vcmp.lt.s32.totalorder %v672_v32, 392  ;;  %v676_v47 = vadd.s32 %v1598_v28, %v643_v33  ;;  %v1629_v50 = vadd.s32 %v1598_v28, %v646_v35  ;;  %s1307_s8 = sshll.u32 %s1407_s7, 4  ;;  %s1308_s8 = int_to_ptr.vmem [resolvable:$false] %s1307_s8 }
  0x52   : > { %v1247_v21 = vld [vmem:[%s1562_s13 + $0x70] sm:$0xff]   ;;  %v1248_v23 = vld [vmem:[%s1562_s13 + $0x78] sm:$0xff]   ;;  %v1632_v51 = vadd.s32 %v1598_v28, %v644_v36  ;;  %v649_v52 = vadd.s32 80, %v1588_v25  ;;  %v647_v53 = vadd.s32 64, %v1588_v25  ;;  %vm706_vm1 = vcmp.lt.s32.totalorder %v674_v40, 392  ;;  %p1305_p7 = pnand %p1304_p3, %p1980_p11  ;;  %s1309_s12 = scalar_lea.vmem %s1308_s8, 8192 }
  0x53   : > { %vm707_vm2 = vcmp.lt.s32.totalorder %v675_v42, 392  ;;  %vm705_vm3 = vcmp.lt.s32.totalorder %v673_v43, 392  ;;  %vm710_vm4 = vcmp.lt.s32.totalorder %v1616_v44, 392  ;;  %vm708_vm5 = vcmp.lt.s32.totalorder %v676_v47, 392  ;;  %p1310_p10 = scmp.lt.s32.totalorder %s1809_s28, %s1308_s8  ;;  %p1311_p12 = scmp.lt.s32.totalorder %s1309_s12, %s1303_s25 }
  0x54   : > { %1100 = vmatpush3.bf16.msra.mxu0 %v1227_v2  ;;  %1153 = vmatpush3.bf16.msra.mxu1 %v1227_v2  ;;  %vm711_vm6 = vcmp.lt.s32.totalorder %v1629_v50, 392  ;;  %vm709_vm7 = vcmp.lt.s32.totalorder %v1632_v51, 392  ;;  %v1655_v63 = vadd.s32 %v1598_v28, %v649_v52  ;;  %v1658_v0 = vadd.s32 %v1598_v28, %v647_v53  ;;  %p1306_p9 = pneg %p1305_p7 }
  0x55   : > { %1101 = vmatprep.subr.bf16.mxu0 %v1228_v3  ;;  %1146 = vmatprep.subr.bf16.mxu1 %v1228_v3  ;;  %v651_v32 = vadd.s32 96, %v1588_v25  ;;  %p1312_p13 = por %p1311_p12, %p1310_p10 }
  0x56   : > { %vm712_vm8 = vcmp.lt.s32.totalorder %v1658_v0, 392  ;;  %vm714_vm9 = vcmp.lt.s32.totalorder %v1655_v63, 392 }
  0x57   : > { %v1723_v44 = vadd.s32 %v1598_v28, %v651_v32  ;;  %p1313_p0 = pnand %p1312_p13, %p1306_p9 }
  0x58   : > { %1102 = vmatpush3.bf16.msra.mxu0 %v1228_v3  ;;  %1154 = vmatpush3.bf16.msra.mxu1 %v1228_v3 }
  0x59   : > { %1103 = vmatprep.subr.bf16.mxu0 %v1229_v5  ;;  %1147 = vmatprep.subr.bf16.mxu1 %v1229_v5  ;;  %vm716_vm13 = vcmp.lt.s32.totalorder %v1723_v44, 392  ;;  %v658_v44 = vadd.s32 152, %v1588_v25 }
  0x5c   : > { %1104 = vmatpush3.bf16.msra.mxu0 %v1229_v5  ;;  %1155 = vmatpush3.bf16.msra.mxu1 %v1229_v5 }
  0x5d   : > { %1105 = vmatprep.subr.bf16.mxu0 %v1230_v6  ;;  %1148 = vmatprep.subr.bf16.mxu1 %v1230_v6 }
  0x60   : > { %1106 = vmatpush3.bf16.msra.mxu0 %v1230_v6  ;;  %1156 = vmatpush3.bf16.msra.mxu1 %v1230_v6 }
  0x61   : > { %1107 = vmatprep.subr.bf16.mxu0 %v1231_v8  ;;  %1149 = vmatprep.subr.bf16.mxu1 %v1231_v8 }
  0x64   : > { %1108 = vmatpush3.bf16.msra.mxu0 %v1231_v8  ;;  %1157 = vmatpush3.bf16.msra.mxu1 %v1231_v8 }
  0x65   : > { %1109 = vmatprep.subr.bf16.mxu0 %v1232_v9  ;;  %1150 = vmatprep.subr.bf16.mxu1 %v1232_v9 }
  0x68   : > { %1110 = vmatpush3.bf16.msra.mxu0 %v1232_v9  ;;  %1158 = vmatpush3.bf16.msra.mxu1 %v1232_v9 }
  0x6b   : > { %1112 = vmatmul.mubr.bf16.vlgmr.msra.gmra.mxu0 %v1234_v10  ;;  %1128 = vmatmul.mubr.bf16.vlgmr.msra.gmra.mxu1 %v1242_v11  ;;  %v650_v10 = vadd.s32 88, %v1588_v25 }
  0x6c   : > { %1115 = vmatprep.mubr.bf16.mxu0 %v1235_v12  ;;  %1131 = vmatprep.mubr.bf16.mxu1 %v1243_v13 }
  0x6d   : > { %v1697_v35 = vadd.s32 %v1598_v28, %v650_v10 }
  0x6f   : > { %vm715_vm10 = vcmp.lt.s32.totalorder %v1697_v35, 392  ;;  %v657_v35 = vadd.s32 144, %v1588_v25 }
  0x73   : > { %1116 = vmatmul.mubr.bf16.gmra.mxu0 %v1236_v14  ;;  %1132 = vmatmul.mubr.bf16.gmra.mxu1 %v1244_v15  ;;  %v648_v14 = vadd.s32 72, %v1588_v25 }
  0x74   : > { %1119 = vmatprep.mubr.bf16.mxu0 %v1237_v16  ;;  %1135 = vmatprep.mubr.bf16.mxu1 %v1245_v17 }
  0x75   : > { %v681_v36 = vadd.s32 %v1598_v28, %v648_v14 }
  0x77   : > { %vm713_vm11 = vcmp.lt.s32.totalorder %v681_v36, 392 }
  0x7b   : > { %1120 = vmatmul.mubr.bf16.gmra.mxu0 %v1238_v18  ;;  %1136 = vmatmul.mubr.bf16.gmra.mxu1 %v1246_v19 }
  0x7c   : > { %1123 = vmatprep.mubr.bf16.mxu0 %v1239_v20  ;;  %1139 = vmatprep.mubr.bf16.mxu1 %v1247_v21  ;;  %v653_v20 = vadd.s32 112, %v1588_v25 }
  0x7e   : > { %v1706_v43 = vadd.s32 %v1598_v28, %v653_v20 }
  0x80   : > { %vm718_vm12 = vcmp.lt.s32.totalorder %v1706_v43, 392 }
  0x83   : > { %1124 = vmatmul.mubr.bf16.gmra.mxu0 %v1240_v22  ;;  %1140 = vmatmul.mubr.bf16.gmra.mxu1 %v1248_v23 }
 0x12b   : > { %v1113_v34 = vpop.f32.mrf.mxu0  ;;  %v1129_v37 = vpop.f32.mrf.mxu1 }
 0x12c   : > { %v487_v38 = vadd.f32 %v1113_v34, %v1596_v27  ;;  %v1610_v39 = vadd.f32 %v1129_v37, %v1596_v27 }
 0x12d   : > { %v478_v41 = vpop.f32.mrf.mxu0  ;;  %v542_v45 = vpop.f32.mrf.mxu1 }
 0x12e   : > { %607 = vst [vmem:[%s1618_s24 + $0x10] sm:$0xff] %v487_v38  ;;  %v479_v46 = vadd.f32 %v1596_v27, %v478_v41  ;;  %623 = vst [vmem:[%s1618_s24 + $0x90] sm:$0xff] %v1610_v39  ;;  %v1626_v48 = vadd.f32 %v1596_v27, %v542_v45  ;;  %v738_v2 = vsel %vm706_vm1, %v487_v38, 0.0 }
 0x12f   : > { %v1114_v49 = vpop.f32.mrf.mxu0  ;;  %v1130_v54 = vpop.f32.mrf.mxu1  ;;  %v807_v16 = vmul.f32 %v738_v2, %v487_v38 }
 0x130   : > { %605 = vst [vmem:[%s1618_s24] sm:$0xff] %v479_v46  ;;  %v490_v55 = vadd.f32 %v1114_v49, %v1596_v27  ;;  %621 = vst [vmem:[%s1618_s24 + $0x80] sm:$0xff] %v1626_v48  ;;  %v1641_v56 = vadd.f32 %v1130_v54, %v1596_v27  ;;  %v736_v59 = vsel %vm704_vm0, %v479_v46, 0.0 }
 0x131   : > { %v481_v57 = vpop.f32.mrf.mxu0  ;;  %v545_v58 = vpop.f32.mrf.mxu1  ;;  %v805_v6 = vmul.f32 %v736_v59, %v479_v46 }
 0x132   : > { %608 = vst [vmem:[%s1618_s24 + $0x18] sm:$0xff] %v490_v55  ;;  %v482_v60 = vadd.f32 %v1596_v27, %v481_v57  ;;  %624 = vst [vmem:[%s1618_s24 + $0x98] sm:$0xff] %v1641_v56  ;;  %v1650_v61 = vadd.f32 %v1596_v27, %v545_v58  ;;  %v739_v12 = vsel %vm707_vm2, %v490_v55, 0.0 }
 0x133   : > { %v1117_v62 = vpop.f32.mrf.mxu0  ;;  %v1133_v1 = vpop.f32.mrf.mxu1  ;;  %v808_v26 = vmul.f32 %v739_v12, %v490_v55 }
 0x134   : > { %606 = vst [vmem:[%s1618_s24 + $0x8] sm:$0xff] %v482_v60  ;;  %v737_v3 = vsel %vm705_vm3, %v482_v60, 0.0  ;;  %v1664_v4 = vadd.f32 %v1117_v62, %v1596_v27  ;;  %622 = vst [vmem:[%s1618_s24 + $0x88] sm:$0xff] %v1650_v61  ;;  %v1669_v5 = vadd.f32 %v1133_v1, %v1596_v27 }
 0x135   : > { %v768_v7 = vadd.f32 %v737_v3, %v736_v59  ;;  %v806_v8 = vmul.f32 %v737_v3, %v482_v60  ;;  %v494_v9 = vpop.f32.mrf.mxu0  ;;  %v558_v11 = vpop.f32.mrf.mxu1  ;;  %v654_v60 = vadd.s32 120, %v1588_v25 }
 0x136   : > { %611 = vst [vmem:[%s1618_s24 + $0x30] sm:$0xff] %v1664_v4  ;;  %v495_v13 = vadd.f32 %v1596_v27, %v494_v9  ;;  %627 = vst [vmem:[%s1618_s24 + $0xb0] sm:$0xff] %v1669_v5  ;;  %v1680_v15 = vadd.f32 %v1596_v27, %v558_v11  ;;  %v742_v46 = vsel %vm710_vm4, %v1664_v4, 0.0 }
 0x137   : > { %v769_v17 = vadd.f32 %v768_v7, %v738_v2  ;;  %v837_v18 = vadd.f32 %v806_v8, %v805_v6  ;;  %v1118_v19 = vpop.f32.mrf.mxu0  ;;  %v1134_v21 = vpop.f32.mrf.mxu1  ;;  %v811_v1 = vmul.f32 %v742_v46, %v1664_v4 }
 0x138   : > { %609 = vst [vmem:[%s1618_s24 + $0x20] sm:$0xff] %v495_v13  ;;  %v740_v22 = vsel %vm708_vm5, %v495_v13, 0.0  ;;  %v506_v23 = vadd.f32 %v1118_v19, %v1596_v27  ;;  %625 = vst [vmem:[%s1618_s24 + $0xa0] sm:$0xff] %v1680_v15  ;;  %v1690_v24 = vadd.f32 %v1134_v21, %v1596_v27 }
 0x139   : > { %v838_v29 = vadd.f32 %v837_v18, %v807_v16  ;;  %v770_v30 = vadd.f32 %v769_v17, %v739_v12  ;;  %v497_v31 = vpop.f32.mrf.mxu0  ;;  %v561_v33 = vpop.f32.mrf.mxu1  ;;  %v809_v40 = vmul.f32 %v740_v22, %v495_v13  ;;  %v652_v13 = vadd.s32 104, %v1588_v25 }
 0x13a   : > { %612 = vst [vmem:[%s1618_s24 + $0x38] sm:$0xff] %v506_v23  ;;  %v498_v34 = vadd.f32 %v1596_v27, %v497_v31  ;;  %628 = vst [vmem:[%s1618_s24 + $0xb8] sm:$0xff] %v1690_v24  ;;  %v1703_v37 = vadd.f32 %v1596_v27, %v561_v33  ;;  %v743_v51 = vsel %vm711_vm6, %v506_v23, 0.0  ;;  %v1753_v16 = vadd.s32 %v1598_v28, %v654_v60 }
 0x13b   : > { %v771_v38 = vadd.f32 %v770_v30, %v740_v22  ;;  %v839_v41 = vadd.f32 %v838_v29, %v808_v26  ;;  %v1121_v42 = vpop.f32.mrf.mxu0  ;;  %v1137_v45 = vpop.f32.mrf.mxu1  ;;  %v812_v4 = vmul.f32 %v743_v51, %v506_v23  ;;  %v655_v22 = vadd.s32 128, %v1588_v25 }
 0x13c   : > { %610 = vst [vmem:[%s1618_s24 + $0x28] sm:$0xff] %v498_v34  ;;  %v741_v47 = vsel %vm709_vm7, %v498_v34, 0.0  ;;  %v1715_v49 = vadd.f32 %v1121_v42, %v1596_v27  ;;  %626 = vst [vmem:[%s1618_s24 + $0xa8] sm:$0xff] %v1703_v37  ;;  %v1720_v52 = vadd.f32 %v1137_v45, %v1596_v27  ;;  %v685_v63 = vadd.s32 %v1598_v28, %v652_v13 }
 0x13d   : > { %v840_v53 = vadd.f32 %v839_v41, %v809_v40  ;;  %v772_v54 = vadd.f32 %v771_v38, %v741_v47  ;;  %v810_v55 = vmul.f32 %v741_v47, %v498_v34  ;;  %v510_v57 = vpop.f32.mrf.mxu0  ;;  %v574_v58 = vpop.f32.mrf.mxu1  ;;  %v656_v42 = vadd.s32 136, %v1588_v25 }
 0x13e   : > { %615 = vst [vmem:[%s1618_s24 + $0x50] sm:$0xff] %v1715_v49  ;;  %v511_v59 = vadd.f32 %v1596_v27, %v510_v57  ;;  %631 = vst [vmem:[%s1618_s24 + $0xd0] sm:$0xff] %v1720_v52  ;;  %v1734_v62 = vadd.f32 %v1596_v27, %v574_v58  ;;  %v746_v26 = vsel %vm714_vm9, %v1715_v49, 0.0  ;;  %v1794_v58 = vadd.s32 %v1598_v28, %v655_v22 }
 0x13f   : > { %v773_v2 = vadd.f32 %v772_v54, %v742_v46  ;;  %v841_v3 = vadd.f32 %v840_v53, %v810_v55  ;;  %v1122_v6 = vpop.f32.mrf.mxu0  ;;  %v1138_v50 = vpop.f32.mrf.mxu1  ;;  %v815_v46 = vmul.f32 %v746_v26, %v1715_v49  ;;  %vm717_vm14 = vcmp.lt.s32.totalorder %v685_v63, 392 }
 0x140   : > { %613 = vst [vmem:[%s1618_s24 + $0x40] sm:$0xff] %v511_v59  ;;  %v744_v7 = vsel %vm712_vm8, %v511_v59, 0.0  ;;  %v522_v8 = vadd.f32 %v1122_v6, %v1596_v27  ;;  %629 = vst [vmem:[%s1618_s24 + $0xc0] sm:$0xff] %v1734_v62  ;;  %v1745_v9 = vadd.f32 %v1138_v50, %v1596_v27  ;;  %v689_v50 = vadd.s32 %v1598_v28, %v656_v42 }
 0x141   : > { %v842_v10 = vadd.f32 %v841_v3, %v811_v1  ;;  %v774_v11 = vadd.f32 %v773_v2, %v743_v51  ;;  %v513_v12 = vpop.f32.mrf.mxu0  ;;  %v577_v0 = vpop.f32.mrf.mxu1  ;;  %v813_v19 = vmul.f32 %v744_v7, %v511_v59  ;;  %vm719_vm15 = vcmp.lt.s32.totalorder %v1753_v16, 392 }
 0x142   : > { %616 = vst [vmem:[%s1618_s24 + $0x58] sm:$0xff] %v522_v8  ;;  %v514_v14 = vadd.f32 %v1596_v27, %v513_v12  ;;  %632 = vst [vmem:[%s1618_s24 + $0xd8] sm:$0xff] %v1745_v9  ;;  %v1758_v17 = vadd.f32 %v1596_v27, %v577_v0  ;;  %v747_v36 = vsel %vm715_vm10, %v522_v8, 0.0  ;;  %v690_v12 = vadd.s32 %v1598_v28, %v657_v35 }
 0x143   : > { %v775_v18 = vadd.f32 %v774_v11, %v744_v7  ;;  %v843_v20 = vadd.f32 %v842_v10, %v812_v4  ;;  %v1125_v21 = vpop.f32.mrf.mxu0  ;;  %v1141_v23 = vpop.f32.mrf.mxu1  ;;  %v816_v59 = vmul.f32 %v747_v36, %v522_v8  ;;  %vm720_vm0 = vcmp.lt.s32.totalorder %v1794_v58, 392 }
 0x144   : > { %614 = vst [vmem:[%s1618_s24 + $0x48] sm:$0xff] %v514_v14  ;;  %v745_v29 = vsel %vm713_vm11, %v514_v14, 0.0  ;;  %v1767_v30 = vadd.f32 %v1125_v21, %v1596_v27  ;;  %630 = vst [vmem:[%s1618_s24 + $0xc8] sm:$0xff] %v1758_v17  ;;  %v1772_v31 = vadd.f32 %v1141_v23, %v1596_v27 }
 0x145   : > { %v844_v32 = vadd.f32 %v843_v20, %v813_v19  ;;  %v776_v33 = vadd.f32 %v775_v18, %v745_v29  ;;  %v814_v34 = vmul.f32 %v745_v29, %v514_v14  ;;  %v526_v38 = vpop.f32.mrf.mxu0  ;;  %v590_v40 = vpop.f32.mrf.mxu1  ;;  %v659_v18 = vadd.s32 160, %v1588_v25 }
 0x146   : > { %619 = vst [vmem:[%s1618_s24 + $0x70] sm:$0xff] %v1767_v30  ;;  %v527_v41 = vadd.f32 %v1596_v27, %v526_v38  ;;  %635 = vst [vmem:[%s1618_s24 + $0xf0] sm:$0xff] %v1772_v31  ;;  %v1784_v45 = vadd.f32 %v1596_v27, %v590_v40  ;;  %v750_v11 = vsel %vm718_vm12, %v1767_v30, 0.0 }
 0x147   : > { %v777_v47 = vadd.f32 %v776_v33, %v746_v26  ;;  %v845_v53 = vadd.f32 %v844_v32, %v814_v34  ;;  %v1126_v54 = vpop.f32.mrf.mxu0  ;;  %v1142_v55 = vpop.f32.mrf.mxu1 }
 0x148   : > { %617 = vst [vmem:[%s1618_s24 + $0x60] sm:$0xff] %v527_v41  ;;  %v748_v57 = vsel %vm716_vm13, %v527_v41, 0.0  ;;  %v1797_v51 = vadd.f32 %v1126_v54, %v1596_v27  ;;  %633 = vst [vmem:[%s1618_s24 + $0xe0] sm:$0xff] %v1784_v45  ;;  %v1802_v49 = vadd.f32 %v1142_v55, %v1596_v27 }
 0x149   : > { %v846_v60 = vadd.f32 %v845_v53, %v815_v46  ;;  %v778_v1 = vadd.f32 %v777_v47, %v747_v36  ;;  %v529_v2 = vpop.f32.mrf.mxu0  ;;  %v593_v3 = vpop.f32.mrf.mxu1  ;;  %v817_v4 = vmul.f32 %v748_v57, %v527_v41 }
 0x14a   : > { %620 = vst [vmem:[%s1618_s24 + $0x78] sm:$0xff] %v1797_v51  ;;  %v530_v6 = vadd.f32 %v1596_v27, %v529_v2  ;;  %636 = vst [vmem:[%s1618_s24 + $0xf8] sm:$0xff] %v1802_v49  ;;  %v1819_v7 = vadd.f32 %v1596_v27, %v593_v3 }
 0x14b   : > { %v779_v8 = vadd.f32 %v778_v1, %v748_v57  ;;  %v847_v10 = vadd.f32 %v846_v60, %v816_v59 }
 0x14c   : > { %618 = vst [vmem:[%s1618_s24 + $0x68] sm:$0xff] %v530_v6  ;;  %v749_v27 = vsel %vm717_vm14, %v530_v6, 0.0  ;;  %634 = vst [vmem:[%s1618_s24 + $0xe8] sm:$0xff] %v1819_v7 }
 0x14d   : > { %v848_v13 = vadd.f32 %v847_v10, %v817_v4  ;;  %v780_v0 = vadd.f32 %v779_v8, %v749_v27  ;;  %v818_v14 = vmul.f32 %v749_v27, %v530_v6 }
 0x14e   : > { %1316 = shalt.err (!%p1313_p0)
}
 0x14f   : > { %s1317_s13 = scalar_lea.hbm %s1807_s11, 4096  ;;  %s1321_s5 = scalar_lea.hbm %s1963_s3, 8192 }
 0x150   : > { %p1318_p5 = scmp.ne.s32.totalorder %s1807_s11, %s1317_s13  ;;  %p1322_p4 = scmp.lt.s32.totalorder %s1807_s11, %s1963_s3 }
 0x151   : > { %p1323_p6 = scmp.lt.s32.totalorder %s1321_s5, %s1317_s13 }
 0x152   : > { %p1319_p2 = pnand %p1318_p5, %p1980_p11 }
 0x153   : > { %p1324_p8 = por %p1323_p6, %p1322_p4 }
 0x154   : > { %p1320_p1 = pneg %p1319_p2 }
 0x156   : > { %p1325_p3 = pnand %p1324_p8, %p1320_p1 }
 0x158   : > { %1328 = shalt.err (!%p1325_p3)
}
 0x159   : > { %s1408_s26 = smov 128   ;;  %s1409_s29 = smov 8   ;;  %v751_v43 = vsel %vm719_vm15, %v1797_v51, 0.0  ;;  %v691_v19 = vadd.s32 %v1598_v28, %v658_v44  ;;  %vm721_vm1 = vcmp.lt.s32.totalorder %v689_v50, 392  ;;  %v819_v20 = vmul.f32 %v750_v11, %v1767_v30 }
 0x15a   : > { %1165 = dma.vmem_to_hbm [thread:$0]  (%p1980_p11), %s1809_s28, 4096, %s1807_s11, %s878_s20, %s1408_s26, %s1408_s26, %s1409_s29   ;;  %v781_v21 = vadd.f32 %v780_v0, %v750_v11  ;;  %v849_v22 = vadd.f32 %v848_v13, %v818_v14  ;;  %v660_v23 = vadd.s32 168, %v1588_v25  ;;  %vm722_vm2 = vcmp.lt.s32.totalorder %v690_v12, 392 }
 0x15b   : > { %v752_v26 = vsel %vm720_vm0, %v1626_v48, 0.0  ;;  %v661_v29 = vadd.s32 176, %v1588_v25  ;;  %v820_v32 = vmul.f32 %v751_v43, %v1797_v51  ;;  %v692_v34 = vadd.s32 %v1598_v28, %v659_v18  ;;  %s1035_s28 = sshll.u32 %s1558_s30, 1  ;;  %s1066_s14 = sshll.u32 %s1457_s19, 5 }
 0x15c   : > { %v850_v16 = vadd.f32 %v849_v22, %v819_v20  ;;  %v782_v33 = vadd.f32 %v781_v21, %v751_v43  ;;  %vm723_vm3 = vcmp.lt.s32.totalorder %v691_v19, 392  ;;  %v753_v30 = vsel %vm721_vm1, %v1650_v61, 0.0  ;;  %s241_s11 = scalar_lea.vmem [#allocation8], %s1035_s28  ;;  %s1923_s8 = scalar_lea.hbm %s1964_s4, %s1066_s14 }
 0x15d   : > { %v662_v38 = vadd.s32 184, %v1588_v25  ;;  %v821_v63 = vmul.f32 %v752_v26, %v1626_v48  ;;  %v693_v41 = vadd.s32 %v1598_v28, %v660_v23  ;;  %v754_v42 = vsel %vm722_vm2, %v1610_v39, 0.0  ;;  %s912_s20 = sshll.u32 %s241_s11, 4  ;;  %s883_s12 = scalar_lea.sflag [#allocation9], %s1558_s30  ;;  %s913_s20 = int_to_ptr.vmem [resolvable:$true] %s912_s20 }
 0x15e   : > { %v783_v40 = vadd.f32 %v782_v33, %v752_v26  ;;  %v851_v36 = vadd.f32 %v850_v16, %v820_v32  ;;  %v694_v46 = vadd.s32 %v1598_v28, %v661_v29  ;;  %v663_v47 = vadd.s32 192, %v1588_v25  ;;  %s1329_s13 = scalar_lea.vmem %s913_s20, 32  ;;  %s1410_s19 = smov [#allocation8]  }
 0x15f   : > { %v822_v35 = vmul.f32 %v753_v30, %v1650_v61  ;;  %vm724_vm4 = vcmp.lt.s32.totalorder %v692_v34, 392  ;;  %v755_v55 = vsel %vm723_vm3, %v1641_v56, 0.0  ;;  %v695_v57 = vadd.s32 %v1598_v28, %v662_v38  ;;  %p1330_p7 = scmp.ne.s32.totalorder %s913_s20, %s1329_s13  ;;  %s1333_s21 = sshll.u32 %s1410_s19, 4  ;;  %s1334_s21 = int_to_ptr.vmem [resolvable:$false] %s1333_s21 }
 0x160   : > { %v784_v53 = vadd.f32 %v783_v40, %v753_v30  ;;  %v852_v54 = vadd.f32 %v851_v36, %v821_v63  ;;  %v664_v48 = vadd.s32 200, %v1588_v25  ;;  %v823_v58 = vmul.f32 %v754_v42, %v1610_v39  ;;  %s1335_s23 = scalar_lea.vmem %s1334_s21, 64  ;;  %p1336_p12 = scmp.lt.s32.totalorder %s913_s20, %s1334_s21 }
 0x161   : > { %vm725_vm5 = vcmp.lt.s32.totalorder %v693_v41, 392  ;;  %v756_v60 = vsel %vm724_vm4, %v1680_v15, 0.0  ;;  %v665_v1 = vadd.s32 208, %v1588_v25  ;;  %v696_v2 = vadd.s32 %v1598_v28, %v663_v47  ;;  %p1331_p9 = pnand %p1330_p7, %p1980_p11  ;;  %p1337_p13 = scmp.lt.s32.totalorder %s1335_s23, %s1329_s13 }
 0x162   : > { %v785_v51 = vadd.f32 %v784_v53, %v754_v42  ;;  %v853_v59 = vadd.f32 %v852_v54, %v822_v35  ;;  %v824_v61 = vmul.f32 %v755_v55, %v1641_v56  ;;  %vm726_vm6 = vcmp.lt.s32.totalorder %v694_v46, 392 }
 0x163   : > { %v757_v6 = vsel %vm725_vm5, %v1703_v37, 0.0  ;;  %v666_v50 = vadd.s32 216, %v1588_v25  ;;  %v697_v39 = vadd.s32 %v1598_v28, %v664_v48  ;;  %v825_v4 = vmul.f32 %v756_v60, %v1680_v15  ;;  %p1332_p10 = pneg %p1331_p9  ;;  %p1338_p0 = por %p1337_p13, %p1336_p12 }
 0x164   : > { %v854_v3 = vadd.f32 %v853_v59, %v823_v58  ;;  %v786_v44 = vadd.f32 %v785_v51, %v755_v55  ;;  %vm727_vm7 = vcmp.lt.s32.totalorder %v695_v57, 392  ;;  %v758_v11 = vsel %vm726_vm6, %v1669_v5, 0.0 }
 0x165   : > { %v698_v12 = vadd.s32 %v1598_v28, %v665_v1  ;;  %vm728_vm8 = vcmp.lt.s32.totalorder %v696_v2, 392  ;;  %v826_v13 = vmul.f32 %v757_v6, %v1703_v37  ;;  %v667_v0 = vadd.s32 224, %v1588_v25  ;;  %p1339_p5 = pnand %p1338_p0, %p1332_p10 }
 0x166   : > { %v787_v8 = vadd.f32 %v786_v44, %v756_v60  ;;  %v855_v10 = vadd.f32 %v854_v3, %v824_v61  ;;  %v759_v14 = vsel %vm727_vm7, %v1690_v24, 0.0  ;;  %v699_v18 = vadd.s32 %v1598_v28, %v666_v50 }
 0x167   : > { %vm729_vm9 = vcmp.lt.s32.totalorder %v697_v39, 392  ;;  %v827_v15 = vmul.f32 %v758_v11, %v1669_v5  ;;  %v668_v20 = vadd.s32 232, %v1588_v25  ;;  %vm730_vm10 = vcmp.lt.s32.totalorder %v698_v12, 392 }
 0x168   : > { %v856_v56 = vadd.f32 %v855_v10, %v825_v4  ;;  %v788_v27 = vadd.f32 %v787_v8, %v757_v6  ;;  %v760_v21 = vsel %vm728_vm8, %v1734_v62, 0.0  ;;  %v669_v22 = vadd.s32 240, %v1588_v25 }
 0x169   : > { %v828_v37 = vmul.f32 %v759_v14, %v1690_v24  ;;  %v700_v29 = vadd.s32 %v1598_v28, %v667_v0  ;;  %vm731_vm11 = vcmp.lt.s32.totalorder %v699_v18, 392  ;;  %v761_v32 = vsel %vm729_vm9, %v1758_v17, 0.0 }
 0x16a   : > { %v789_v43 = vadd.f32 %v788_v27, %v758_v11  ;;  %v857_v19 = vadd.f32 %v856_v56, %v826_v13  ;;  %v670_v5 = vadd.s32 248, %v1588_v25  ;;  %v829_v33 = vmul.f32 %v760_v21, %v1734_v62 }
 0x16b   : > { %v701_v30 = vadd.s32 %v1598_v28, %v668_v20  ;;  %v762_v38 = vsel %vm730_vm10, %v1720_v52, 0.0  ;;  %v702_v63 = vadd.s32 %v1598_v28, %v669_v22  ;;  %v830_v36 = vmul.f32 %v761_v32, %v1758_v17 }
 0x16c   : > { %v858_v23 = vadd.f32 %v857_v19, %v827_v15  ;;  %v790_v26 = vadd.f32 %v789_v43, %v759_v14  ;;  %vm732_vm12 = vcmp.lt.s32.totalorder %v700_v29, 392  ;;  %v763_v41 = vsel %vm731_vm11, %v1745_v9, 0.0 }
 0x16d   : > { %v703_v42 = vadd.s32 %v1598_v28, %v670_v5  ;;  %v831_v25 = vmul.f32 %v762_v38, %v1720_v52  ;;  %vm733_vm13 = vcmp.lt.s32.totalorder %v701_v30, 392  ;;  %v764_v47 = vsel %vm732_vm12, %v1784_v45, 0.0 }
 0x16e   : > { %v791_v16 = vadd.f32 %v790_v26, %v760_v21  ;;  %v859_v34 = vadd.f32 %v858_v23, %v828_v37  ;;  %v832_v53 = vmul.f32 %v763_v41, %v1745_v9  ;;  %vm734_vm14 = vcmp.lt.s32.totalorder %v702_v63, 392 }
 0x16f   : > { %v765_v55 = vsel %vm733_vm13, %v1819_v7, 0.0  ;;  %v833_v57 = vmul.f32 %v764_v47, %v1784_v45  ;;  %vm735_vm15 = vcmp.lt.s32.totalorder %v703_v42, 392  ;;  %v766_v28 = vsel %vm734_vm14, %v1772_v31, 0.0 }
 0x170   : > { %v860_v24 = vadd.f32 %v859_v34, %v829_v33  ;;  %v792_v40 = vadd.f32 %v791_v16, %v761_v32  ;;  %v834_v51 = vmul.f32 %v765_v55, %v1819_v7  ;;  %v767_v59 = vsel %vm735_vm15, %v1802_v49, 0.0 }
 0x171   : > { %v835_v9 = vmul.f32 %v766_v28, %v1772_v31  ;;  %v836_v2 = vmul.f32 %v767_v59, %v1802_v49  ;;  %vm874_vm0 = vcmask 1040384  }
 0x172   : > { %v793_v46 = vadd.f32 %v792_v40, %v762_v38  ;;  %v861_v62 = vadd.f32 %v860_v24, %v830_v36 }
 0x174   : > { %v862_v35 = vadd.f32 %v861_v62, %v831_v25  ;;  %v794_v54 = vadd.f32 %v793_v46, %v763_v41 }
 0x176   : > { %v795_v17 = vadd.f32 %v794_v54, %v764_v47  ;;  %v863_v48 = vadd.f32 %v862_v35, %v832_v53 }
 0x178   : > { %v864_v52 = vadd.f32 %v863_v48, %v833_v57  ;;  %v796_v58 = vadd.f32 %v795_v17, %v765_v55 }
 0x17a   : > { %v797_v60 = vadd.f32 %v796_v58, %v766_v28  ;;  %v865_v1 = vadd.f32 %v864_v52, %v834_v51 }
 0x17c   : > { %v798_v61 = vadd.f32 %v797_v60, %v767_v59  ;;  %v866_v45 = vadd.f32 %v865_v1, %v835_v9 }
 0x17e   : > { %v799_v3 = vrot.slane %v798_v61, 4  ;;  %v867_v44 = vadd.f32 %v866_v45, %v836_v2 }
 0x180   : > { %v800_v6 = vadd.f32 %v799_v3, %v798_v61  ;;  %v868_v50 = vrot.slane %v867_v44, 4 }
 0x182   : > { %v801_v39 = vrot.slane %v800_v6, 2  ;;  %v869_v8 = vadd.f32 %v868_v50, %v867_v44 }
 0x184   : > { %v802_v7 = vadd.f32 %v801_v39, %v800_v6  ;;  %v870_v4 = vrot.slane %v869_v8, 2 }
 0x186   : > { %v803_v10 = vrot.slane %v802_v7, 1  ;;  %v871_v31 = vadd.f32 %v870_v4, %v869_v8 }
 0x188   : > { %v872_v11 = vrot.slane %v871_v31, 1  ;;  %v804_v49 = vadd.f32 %v803_v10, %v802_v7 }
 0x18a   : > { %v873_v12 = vadd.f32 %v872_v11, %v871_v31 }
 0x18c   : > { %v875_v56 = vsel %vm874_vm0, %v804_v49, %v873_v12 }
 0x18d   : > { %876 = vst [vmem:[%s241_s11] sm:$0x3] %v875_v56 }
 0x18e   : > { %1342 = shalt.err (!%p1339_p5)
}
 0x18f   : > { %s1343_s5 = scalar_lea.hbm %s1923_s8, 32  ;;  %s1347_s24 = scalar_lea.hbm %s1964_s4, 64 }
 0x190   : > { %p1344_p2 = scmp.ne.s32.totalorder %s1923_s8, %s1343_s5  ;;  %p1348_p6 = scmp.lt.s32.totalorder %s1923_s8, %s1964_s4 }
 0x191   : > { %p1349_p8 = scmp.lt.s32.totalorder %s1347_s24, %s1343_s5 }
 0x192   : > { %p1345_p1 = pnand %p1344_p2, %p1980_p11 }
 0x193   : > { %p1350_p3 = por %p1349_p8, %p1348_p6 }
 0x194   : > { %p1346_p4 = pneg %p1345_p1 }
 0x196   : > { %p1351_p7 = pnand %p1350_p3, %p1346_p4 }
 0x198   : > { %1354 = shalt.err (!%p1351_p7)
}
 0x199   : > { %1166 = dma.vmem_to_hbm [thread:$0]  (%p1980_p11), %s913_s20, 32, %s1923_s8, %s883_s12  }
 0x19a PF: > { %s924_s28 = sand.u32 1, %s1389_s15   ;;  %p1981_p9 = scmp.ne.s32.totalorder %s1970_s22, 0 }
 0x19b   : > { %p1982_p10 = scmp.ge.s32.totalorder %s1401_s18, 2  ;;  %s925_s14 = scalar_lea.sflag [#allocation4], %s924_s28 }
 0x19d   : > { %p1178_p12 = pnand %p1982_p10, %p1981_p9 }
 0x19f   : > { %p1179_p13 = pneg %p1178_p12 }
 0x1a1   : > { %1380 = dma.done.wait (%p1179_p13), %s925_s14, 4096  }
 0x1a2   : > { %1382 = vsyncadd (%p1179_p13), %s925_s14, 4294963200  ;;  %s934_s11 = scalar_lea.sflag [#allocation9], %s924_s28 }
 0x1a3   : > { %1384 = dma.done.wait (%p1179_p13), %s934_s11, 32  }
 0x1a4   : > { %1386 = vsyncadd (%p1179_p13), %s934_s11, 4294967264  ;;  %p22_p11 = scmp.ge.s32.totalorder %s1490_s27, 4   ;;  %s1983_s15 = smov %s1393_s16 }
 0x1a5   : > { %s1984_s16 = smov %s1397_s17  ;;  %s1985_s17 = smov %s1510_s9 }
 0x1a6   : > { %s1986_s18 = smov %s1490_s27  ;;  %24 = sbr.rel (!%p22_p11) target bundleno = 8 (0x8), region = 98 }
 0x1ab   :  { %939 = vsyncpa [#allocation3], 1 }
 0x1ac   :  { %941 = vsyncpa [#allocation3 + $0x1], 1 }
 0x1ad   :  { %942 = vsyncpa [#allocation6], 1 }
 0x1ae   :  { %943 = vsyncpa [#allocation4], 1 }
 0x1af   :  { %945 = vsyncpa [#allocation4 + $0x1], 1 }
 0x1b0   :  { %946 = vsyncpa [#allocation9], 1 }
 0x1b1   :  { %948 = vsyncpa [#allocation9 + $0x1], 1 }

</bundles_post_ra>
